<compile_context>
chip_gen: v5e
topology: v5e:2x2
jax: 0.10.0
libtpu: 0.0.40
codegen_flags: <defaults>
</compile_context>

<pallas_src>
import functools

import jax
import jax.numpy as jnp
from jax import lax
from jax.experimental import pallas as pl
from jax.experimental.pallas import tpu as pltpu

BN_EPS = 1e-5


def _round_up(x, m):
    return (x + m - 1) // m * m


def _cdiv(a, b):
    return (a + b - 1) // b


def _vmem_limit_bytes():
    """Generation-aware scoped-VMEM limit (v7x: 64 MiB/TC, v5e/v6e: 128 MiB)."""
    kind = ""
    try:
        kind = jax.devices()[0].device_kind.lower()
    except Exception:
        pass
    if "v7" in kind or "7x" in kind:
        return 40 * 1024 * 1024
    return 64 * 1024 * 1024


# --------------------------------------------------------------------- pass 1
def _make_conv_stats_kernel(taps, tm, single_tile):
    """Conv as KH*KW shifted sub-GEMMs + per-tile partial BN statistics.

    taps: static list of (phase_index, flat_offset), one per (kh, kw)."""

    def kernel(w_ref, mask_ref, x_ref, y_ref, s_ref):
        # w_ref   : [T, OC, C]      bf16  resident per-tap weight matrices
        # mask_ref: [1, TM]         bf16  validity mask (wide/pad columns = 0)
        # x_ref   : [1, NPH, C, L]  bf16  whole flattened phase image (1 batch)
        # y_ref   : [1, OC, TM]     bf16  pre-BN conv output tile
        # s_ref   : [1, 1, OC, 2]   f32   partial (sum, sum-of-squares)
        if single_tile:
            base = 0
        else:
            base = pl.multiple_of(pl.program_id(1) * tm, 128)
        acc = None
        for t, (p, off) in enumerate(taps):
            sub = x_ref[0, p, :, pl.ds(base + off, tm)]          # [C, TM] bf16
            d = jnp.dot(w_ref[t], sub,
                        preferred_element_type=jnp.float32)      # [OC, TM] f32
            acc = d if acc is None else acc + d
        ym = acc * mask_ref[...].astype(jnp.float32)   # zero invalid columns
        y_ref[0] = ym.astype(y_ref.dtype)
        # Masked columns are exactly zero -> they contribute nothing to either
        # sum; dividing by the true N*OH*OW in the wrapper gives exact stats.
        s_ref[0, 0, :, 0:1] = jnp.sum(ym, axis=1, keepdims=True)
        s_ref[0, 0, :, 1:2] = jnp.sum(ym * ym, axis=1, keepdims=True)

    return kernel


# --------------------------------------------------------------------- pass 2
def _bn_relu6_kernel(scale_ref, bias_ref, y_ref, o_ref):
    y = y_ref[0].astype(jnp.float32)                              # [OC, TM2]
    o_ref[0] = jnp.clip(y * scale_ref[...] + bias_ref[...], 0.0, 6.0)


# --------------------------------------------------------------------- wrapper
@functools.partial(jax.jit, static_argnames=("stride", "tile_m"))
def conv_bn_forward(x, weight, gamma, beta, *, stride=1, tile_m=2048):
    """x: [N, C, H, W] f32 (NCHW), weight: [OC, C, KH, KW] (OIHW)."""
    N, C, H, W = x.shape
    OC, _, KH, KW = weight.shape
    s = stride

    # --- ZeroPad2d: (0,1,0,1) if stride==2 else kernel_size//2 on all sides.
    if s == 2:
        pad_h, pad_w = (0, 1), (0, 1)
    else:
        p = KH // 2
        pad_h, pad_w = (p, p), (p, p)
    xp = jnp.pad(x, ((0, 0), (0, 0), pad_h, pad_w)).astype(jnp.bfloat16)
    Hp = H + pad_h[0] + pad_h[1]
    Wp = W + pad_w[0] + pad_w[1]
    OH = (Hp - KH) // s + 1
    OW = (Wp - KW) // s + 1

    # --- phase decomposition (identity for stride 1, space-to-depth for 2):
    # phases[n, ph*s + pw, c, i, j] = xp[n, c, s*i + ph, s*j + pw]
    Hp2, Wp2 = _round_up(Hp, s), _round_up(Wp, s)
    xp2 = jnp.pad(xp, ((0, 0), (0, 0), (0, Hp2 - Hp), (0, Wp2 - Wp)))
    NPH = s * s
    Hph, Wph = Hp2 // s, Wp2 // s
    phases = xp2.reshape(N, C, Hph, s, Wph, s).transpose(0, 3, 5, 1, 2, 4)
    phases = phases.reshape(N, NPH, C, Hph, Wph)

    # Conv tap (kh, kw) reads phase (kh%s, kw%s) at constant offset
    # (kh//s)*Wph + (kw//s) relative to the wide-flattened output index.
    taps = [((kh % s) * s + (kw % s), (kh // s) * Wph + (kw // s))
            for kh in range(KH) for kw in range(KW)]
    max_off = max(off for _, off in taps)
    T = KH * KW

    # Wide flattened output: M = OH * Wph (columns >= OW masked & sliced off).
    Mw = OH * Wph

    # --- tile-size / VMEM budgeting ------------------------------------------
    budget = _vmem_limit_bytes()
    tm = max(128, min(_round_up(tile_m, 128), _round_up(Mw, 128)))

    def _footprint(tm_):
        mwp = _cdiv(Mw, tm_) * tm_
        lflat = max(_round_up(mwp + max_off, 128), Hph * Wph)
        return (2 * NPH * C * lflat * 2            # resident phase slab (x2 buf)
                + 2 * OC * tm_ * 2 + 2 * tm_ * 2   # y + mask tiles
                + 4 * OC * tm_ * 4                 # f32 accumulator temporaries
                + NPH * C * tm_ * 2)

    while tm > 128 and _footprint(tm) > budget // 2:
        tm -= 128
    n_mtiles = _cdiv(Mw, tm)
    Mw_pad = n_mtiles * tm
    Lflat = max(_round_up(Mw_pad + max_off, 128), Hph * Wph)

    xflat = phases.reshape(N, NPH, C, Hph * Wph)
    xflat = jnp.pad(xflat, ((0, 0), (0, 0), (0, 0), (0, Lflat - Hph * Wph)))

    # Validity mask over wide-flat output positions (bf16, tiny, resident).
    flat_idx = jnp.arange(Mw_pad, dtype=jnp.int32)
    mask = ((flat_idx % Wph < OW) & (flat_idx // Wph < OH))
    mask = mask.astype(jnp.bfloat16).reshape(1, Mw_pad)

    # Per-tap weight matrices, tap order = kh*KW + kw.
    w_taps = weight.astype(jnp.bfloat16).transpose(2, 3, 0, 1).reshape(T, OC, C)

    # ---- pass 1: conv sub-GEMMs (f32 acc) + partial BN sums, bf16 y_pre -----
    kernel1 = _make_conv_stats_kernel(taps, tm, n_mtiles == 1)
    cost1 = pl.CostEstimate(
        flops=2 * N * Mw_pad * OC * C * T,
        transcendentals=0,
        bytes_accessed=(N * NPH * C * Lflat * 2 + N * Mw_pad * 2
                        + T * OC * C * 2 + N * OC * Mw_pad * 2
                        + N * n_mtiles * OC * 2 * 4))
    y_pre, stats = pl.pallas_call(
        kernel1,
        out_shape=(
            jax.ShapeDtypeStruct((N, OC, Mw_pad), jnp.bfloat16),
            jax.ShapeDtypeStruct((N, n_mtiles, OC, 2), jnp.float32),
        ),
        grid_spec=pltpu.PrefetchScalarGridSpec(
            num_scalar_prefetch=0,
            grid=(N, n_mtiles),
            in_specs=[
                pl.BlockSpec((T, OC, C), lambda n, m: (0, 0, 0)),
                pl.BlockSpec((1, tm), lambda n, m: (0, m)),
                pl.BlockSpec((1, NPH, C, Lflat), lambda n, m: (n, 0, 0, 0)),
            ],
            out_specs=(
                pl.BlockSpec((1, OC, tm), lambda n, m: (n, 0, m)),
                pl.BlockSpec((1, 1, OC, 2), lambda n, m: (n, m, 0, 0)),
            ),
        ),
        compiler_params=pltpu.CompilerParams(
            dimension_semantics=("parallel", "parallel"),
            vmem_limit_bytes=budget),
        cost_estimate=cost1,
    )(w_taps, mask, xflat)

    # ---- tiny [OC] statistics combine (training-mode BN, biased variance) ---
    count = jnp.float32(N * OH * OW)
    ssum = jnp.sum(stats[..., 0], axis=(0, 1))
    ssq = jnp.sum(stats[..., 1], axis=(0, 1))
    mean = ssum / count
    var = jnp.maximum(ssq / count - mean * mean, 0.0)     # clamp (f32 E[y^2]-E[y]^2)
    inv_std = lax.rsqrt(var + BN_EPS)
    scale = gamma.astype(jnp.float32) * inv_std
    bias = beta.astype(jnp.float32) - mean * scale
    scale2d = scale.reshape(OC, 1)
    bias2d = bias.reshape(OC, 1)

    # ---- pass 2: normalize + ReLU6 (pure mem-bound, wide lane tiles) --------
    tm2 = Mw_pad if (OC * Mw_pad * (2 + 4) * 2 + (1 << 16)) <= budget // 2 else tm
    n_m2 = Mw_pad // tm2
    cost2 = pl.CostEstimate(
        flops=4 * N * OC * Mw_pad,
        transcendentals=0,
        bytes_accessed=N * OC * Mw_pad * (2 + 4) + 2 * OC * 4)
    out = pl.pallas_call(
        _bn_relu6_kernel,
        out_shape=jax.ShapeDtypeStruct((N, OC, Mw_pad), jnp.float32),
        grid_spec=pltpu.PrefetchScalarGridSpec(
            num_scalar_prefetch=0,
            grid=(N, n_m2),
            in_specs=[
                pl.BlockSpec((OC, 1), lambda n, m: (0, 0)),
                pl.BlockSpec((OC, 1), lambda n, m: (0, 0)),
                pl.BlockSpec((1, OC, tm2), lambda n, m: (n, 0, m)),
            ],
            out_specs=pl.BlockSpec((1, OC, tm2), lambda n, m: (n, 0, m)),
        ),
        compiler_params=pltpu.CompilerParams(
            dimension_semantics=("parallel", "parallel"),
            vmem_limit_bytes=budget),
        cost_estimate=cost2,
    )(scale2d, bias2d, y_pre)

    # wide-flat [N, OC, Mw_pad] -> [N, OC, OH, OW]
    out = out[:, :, :OH * Wph].reshape(N, OC, OH, Wph)[:, :, :, :OW]
    return out


# --------------------------------------------------------------------- reference
def _reference(x, weight, gamma, beta, *, stride=1, conv_dtype=jnp.float32):
    """Pure-JAX reference mirroring the PyTorch forward (training-mode BN)."""
    OC, _, KH, KW = weight.shape
    if stride == 2:
        pad = [(0, 1), (0, 1)]
    else:
        p = KH // 2
        pad = [(p, p), (p, p)]
    y = lax.conv_general_dilated(
        x.astype(conv_dtype), weight.astype(conv_dtype),
        window_strides=(stride, stride), padding=pad,
        dimension_numbers=("NCHW", "OIHW", "NCHW"),
        preferred_element_type=jnp.float32)
    mean = jnp.mean(y, axis=(0, 2, 3), keepdims=True)
    var = jnp.mean((y - mean) ** 2, axis=(0, 2, 3), keepdims=True)
    y = (y - mean) * lax.rsqrt(var + BN_EPS)
    y = y * gamma.reshape(1, OC, 1, 1) + beta.reshape(1, OC, 1, 1)
    return jnp.clip(y, 0.0, 6.0)


if __name__ == "__main__":
    def run_case(N, C, H, W, OC, ks, stride, key):
        kx, kw_, kg, kb = jax.random.split(key, 4)
        x = jax.random.normal(kx, (N, C, H, W), dtype=jnp.float32)
        weight = jax.random.normal(kw_, (OC, C, ks, ks), dtype=jnp.float32) * 0.1
        gamma = jax.random.normal(kg, (OC,), dtype=jnp.float32) * 0.1 + 1.0
        beta = jax.random.normal(kb, (OC,), dtype=jnp.float32) * 0.1

        out = conv_bn_forward(x, weight, gamma, beta, stride=stride)
        out = jax.block_until_ready(out)

        # bf16-conv reference mirrors the kernel's MXU numerics (y_pre is also
        # stored in bf16, so BN is applied to quantized activations).
        ref_b = _reference(x, weight, gamma, beta, stride=stride,
                           conv_dtype=jnp.bfloat16)
        ref_f = _reference(x, weight, gamma, beta, stride=stride,
                           conv_dtype=jnp.float32)
        assert out.shape == ref_f.shape, (out.shape, ref_f.shape)
        assert jnp.allclose(out, ref_b, atol=5e-2, rtol=5e-2), \
            float(jnp.max(jnp.abs(out - ref_b)))
        assert jnp.allclose(out, ref_f, atol=2e-1, rtol=2e-1), \
            float(jnp.max(jnp.abs(out - ref_f)))

    key = jax.random.PRNGKey(0)
    k1, k2 = jax.random.split(key)
    # _conv_bn(4, 8, 3, stride=1): symmetric pad branch, single phase.
    run_case(2, 4, 16, 16, 8, 3, 1, k1)
    # _conv_bn(4, 16, 3, stride=2): asymmetric ZeroPad2d + 2x2 phase decomposition.
    run_case(2, 4, 16, 16, 16, 3, 2, k2)

    print("KERNEL_OK")
</pallas_src>

<mosaic_0001>
module attributes {stable_mosaic.version = 11 : i64} {
  func.func @kernel(%arg0: i32, %arg1: i32, %arg2: memref<9x8x4xbf16, #tpu.memory_space<vmem>>, %arg3: memref<1x384xbf16, #tpu.memory_space<vmem>>, %arg4: memref<1x1x4x512xbf16, #tpu.memory_space<vmem>>, %arg5: memref<1x8x384xbf16, #tpu.memory_space<vmem>>, %arg6: memref<1x1x8x2xf32, #tpu.memory_space<vmem>>) attributes {dimension_semantics = [#tpu.dimension_semantics<parallel>, #tpu.dimension_semantics<parallel>], iteration_bounds = array<i64: 2, 1>, scalar_prefetch = 0 : i64, scratch_operands = 0 : i64, tpu.core_type = #tpu.core_type<tc>, window_params = [{pipeline_mode = #tpu.pipeline_mode<synchronous>, transform_indices = @transform_0, window_bounds = array<i64: 9, 8, 4>}, {transform_indices = @transform_1, window_bounds = array<i64: 1, 384>}, {transform_indices = @transform_2, window_bounds = array<i64: 1, 1, 4, 512>}, {transform_indices = @transform_3, window_bounds = array<i64: 1, 8, 384>}, {transform_indices = @transform_4, window_bounds = array<i64: 1, 1, 8, 2>}]} {
    %c0 = arith.constant 0 : index
    %c0_0 = arith.constant 0 : index
    %c0_1 = arith.constant 0 : index
    %c0_2 = arith.constant 0 : index
    %0 = vector.load %arg4[%c0, %c0_0, %c0_1, %c0_2] : memref<1x1x4x512xbf16, #tpu.memory_space<vmem>>, vector<1x1x4x384xbf16>
    %1 = vector.shape_cast %0 : vector<1x1x4x384xbf16> to vector<4x384xbf16>
    %c0_3 = arith.constant 0 : index
    %c0_4 = arith.constant 0 : index
    %c0_5 = arith.constant 0 : index
    %2 = vector.load %arg2[%c0_3, %c0_4, %c0_5] : memref<9x8x4xbf16, #tpu.memory_space<vmem>>, vector<1x8x4xbf16>
    %3 = vector.shape_cast %2 : vector<1x8x4xbf16> to vector<8x4xbf16>
    %cst = arith.constant dense<0.000000e+00> : vector<8x384xf32>
    %4 = tpu.matmul %3, %1, %cst {dimension_numbers = #tpu.dot_dimension_numbers<[1], [0], [0], [1], [0, 0, 1, 1], [], []>} : vector<8x4xbf16>, vector<4x384xbf16>, vector<8x384xf32> -> vector<8x384xf32>
    %c0_6 = arith.constant 0 : index
    %c0_7 = arith.constant 0 : index
    %c0_8 = arith.constant 0 : index
    %c1 = arith.constant 1 : index
    %5 = vector.load %arg4[%c0_6, %c0_7, %c0_8, %c1] : memref<1x1x4x512xbf16, #tpu.memory_space<vmem>>, vector<1x1x4x384xbf16>
    %6 = vector.shape_cast %5 : vector<1x1x4x384xbf16> to vector<4x384xbf16>
    %c1_9 = arith.constant 1 : index
    %c0_10 = arith.constant 0 : index
    %c0_11 = arith.constant 0 : index
    %7 = vector.load %arg2[%c1_9, %c0_10, %c0_11] : memref<9x8x4xbf16, #tpu.memory_space<vmem>>, vector<1x8x4xbf16>
    %8 = vector.shape_cast %7 : vector<1x8x4xbf16> to vector<8x4xbf16>
    %cst_12 = arith.constant dense<0.000000e+00> : vector<8x384xf32>
    %9 = tpu.matmul %8, %6, %cst_12 {dimension_numbers = #tpu.dot_dimension_numbers<[1], [0], [0], [1], [0, 0, 1, 1], [], []>} : vector<8x4xbf16>, vector<4x384xbf16>, vector<8x384xf32> -> vector<8x384xf32>
    %10 = arith.addf %4, %9 : vector<8x384xf32>
    %c0_13 = arith.constant 0 : index
    %c0_14 = arith.constant 0 : index
    %c0_15 = arith.constant 0 : index
    %c2 = arith.constant 2 : index
    %11 = vector.load %arg4[%c0_13, %c0_14, %c0_15, %c2] : memref<1x1x4x512xbf16, #tpu.memory_space<vmem>>, vector<1x1x4x384xbf16>
    %12 = vector.shape_cast %11 : vector<1x1x4x384xbf16> to vector<4x384xbf16>
    %c2_16 = arith.constant 2 : index
    %c0_17 = arith.constant 0 : index
    %c0_18 = arith.constant 0 : index
    %13 = vector.load %arg2[%c2_16, %c0_17, %c0_18] : memref<9x8x4xbf16, #tpu.memory_space<vmem>>, vector<1x8x4xbf16>
    %14 = vector.shape_cast %13 : vector<1x8x4xbf16> to vector<8x4xbf16>
    %cst_19 = arith.constant dense<0.000000e+00> : vector<8x384xf32>
    %15 = tpu.matmul %14, %12, %cst_19 {dimension_numbers = #tpu.dot_dimension_numbers<[1], [0], [0], [1], [0, 0, 1, 1], [], []>} : vector<8x4xbf16>, vector<4x384xbf16>, vector<8x384xf32> -> vector<8x384xf32>
    %16 = arith.addf %10, %15 : vector<8x384xf32>
    %c0_20 = arith.constant 0 : index
    %c0_21 = arith.constant 0 : index
    %c0_22 = arith.constant 0 : index
    %c18 = arith.constant 18 : index
    %17 = vector.load %arg4[%c0_20, %c0_21, %c0_22, %c18] : memref<1x1x4x512xbf16, #tpu.memory_space<vmem>>, vector<1x1x4x384xbf16>
    %18 = vector.shape_cast %17 : vector<1x1x4x384xbf16> to vector<4x384xbf16>
    %c3 = arith.constant 3 : index
    %c0_23 = arith.constant 0 : index
    %c0_24 = arith.constant 0 : index
    %19 = vector.load %arg2[%c3, %c0_23, %c0_24] : memref<9x8x4xbf16, #tpu.memory_space<vmem>>, vector<1x8x4xbf16>
    %20 = vector.shape_cast %19 : vector<1x8x4xbf16> to vector<8x4xbf16>
    %cst_25 = arith.constant dense<0.000000e+00> : vector<8x384xf32>
    %21 = tpu.matmul %20, %18, %cst_25 {dimension_numbers = #tpu.dot_dimension_numbers<[1], [0], [0], [1], [0, 0, 1, 1], [], []>} : vector<8x4xbf16>, vector<4x384xbf16>, vector<8x384xf32> -> vector<8x384xf32>
    %22 = arith.addf %16, %21 : vector<8x384xf32>
    %c0_26 = arith.constant 0 : index
    %c0_27 = arith.constant 0 : index
    %c0_28 = arith.constant 0 : index
    %c19 = arith.constant 19 : index
    %23 = vector.load %arg4[%c0_26, %c0_27, %c0_28, %c19] : memref<1x1x4x512xbf16, #tpu.memory_space<vmem>>, vector<1x1x4x384xbf16>
    %24 = vector.shape_cast %23 : vector<1x1x4x384xbf16> to vector<4x384xbf16>
    %c4 = arith.constant 4 : index
    %c0_29 = arith.constant 0 : index
    %c0_30 = arith.constant 0 : index
    %25 = vector.load %arg2[%c4, %c0_29, %c0_30] : memref<9x8x4xbf16, #tpu.memory_space<vmem>>, vector<1x8x4xbf16>
    %26 = vector.shape_cast %25 : vector<1x8x4xbf16> to vector<8x4xbf16>
    %cst_31 = arith.constant dense<0.000000e+00> : vector<8x384xf32>
    %27 = tpu.matmul %26, %24, %cst_31 {dimension_numbers = #tpu.dot_dimension_numbers<[1], [0], [0], [1], [0, 0, 1, 1], [], []>} : vector<8x4xbf16>, vector<4x384xbf16>, vector<8x384xf32> -> vector<8x384xf32>
    %28 = arith.addf %22, %27 : vector<8x384xf32>
    %c0_32 = arith.constant 0 : index
    %c0_33 = arith.constant 0 : index
    %c0_34 = arith.constant 0 : index
    %c20 = arith.constant 20 : index
    %29 = vector.load %arg4[%c0_32, %c0_33, %c0_34, %c20] : memref<1x1x4x512xbf16, #tpu.memory_space<vmem>>, vector<1x1x4x384xbf16>
    %30 = vector.shape_cast %29 : vector<1x1x4x384xbf16> to vector<4x384xbf16>
    %c5 = arith.constant 5 : index
    %c0_35 = arith.constant 0 : index
    %c0_36 = arith.constant 0 : index
    %31 = vector.load %arg2[%c5, %c0_35, %c0_36] : memref<9x8x4xbf16, #tpu.memory_space<vmem>>, vector<1x8x4xbf16>
    %32 = vector.shape_cast %31 : vector<1x8x4xbf16> to vector<8x4xbf16>
    %cst_37 = arith.constant dense<0.000000e+00> : vector<8x384xf32>
    %33 = tpu.matmul %32, %30, %cst_37 {dimension_numbers = #tpu.dot_dimension_numbers<[1], [0], [0], [1], [0, 0, 1, 1], [], []>} : vector<8x4xbf16>, vector<4x384xbf16>, vector<8x384xf32> -> vector<8x384xf32>
    %34 = arith.addf %28, %33 : vector<8x384xf32>
    %c0_38 = arith.constant 0 : index
    %c0_39 = arith.constant 0 : index
    %c0_40 = arith.constant 0 : index
    %c36 = arith.constant 36 : index
    %35 = vector.load %arg4[%c0_38, %c0_39, %c0_40, %c36] : memref<1x1x4x512xbf16, #tpu.memory_space<vmem>>, vector<1x1x4x384xbf16>
    %36 = vector.shape_cast %35 : vector<1x1x4x384xbf16> to vector<4x384xbf16>
    %c6 = arith.constant 6 : index
    %c0_41 = arith.constant 0 : index
    %c0_42 = arith.constant 0 : index
    %37 = vector.load %arg2[%c6, %c0_41, %c0_42] : memref<9x8x4xbf16, #tpu.memory_space<vmem>>, vector<1x8x4xbf16>
    %38 = vector.shape_cast %37 : vector<1x8x4xbf16> to vector<8x4xbf16>
    %cst_43 = arith.constant dense<0.000000e+00> : vector<8x384xf32>
    %39 = tpu.matmul %38, %36, %cst_43 {dimension_numbers = #tpu.dot_dimension_numbers<[1], [0], [0], [1], [0, 0, 1, 1], [], []>} : vector<8x4xbf16>, vector<4x384xbf16>, vector<8x384xf32> -> vector<8x384xf32>
    %40 = arith.addf %34, %39 : vector<8x384xf32>
    %c0_44 = arith.constant 0 : index
    %c0_45 = arith.constant 0 : index
    %c0_46 = arith.constant 0 : index
    %c37 = arith.constant 37 : index
    %41 = vector.load %arg4[%c0_44, %c0_45, %c0_46, %c37] : memref<1x1x4x512xbf16, #tpu.memory_space<vmem>>, vector<1x1x4x384xbf16>
    %42 = vector.shape_cast %41 : vector<1x1x4x384xbf16> to vector<4x384xbf16>
    %c7 = arith.constant 7 : index
    %c0_47 = arith.constant 0 : index
    %c0_48 = arith.constant 0 : index
    %43 = vector.load %arg2[%c7, %c0_47, %c0_48] : memref<9x8x4xbf16, #tpu.memory_space<vmem>>, vector<1x8x4xbf16>
    %44 = vector.shape_cast %43 : vector<1x8x4xbf16> to vector<8x4xbf16>
    %cst_49 = arith.constant dense<0.000000e+00> : vector<8x384xf32>
    %45 = tpu.matmul %44, %42, %cst_49 {dimension_numbers = #tpu.dot_dimension_numbers<[1], [0], [0], [1], [0, 0, 1, 1], [], []>} : vector<8x4xbf16>, vector<4x384xbf16>, vector<8x384xf32> -> vector<8x384xf32>
    %46 = arith.addf %40, %45 : vector<8x384xf32>
    %c0_50 = arith.constant 0 : index
    %c0_51 = arith.constant 0 : index
    %c0_52 = arith.constant 0 : index
    %c38 = arith.constant 38 : index
    %47 = vector.load %arg4[%c0_50, %c0_51, %c0_52, %c38] : memref<1x1x4x512xbf16, #tpu.memory_space<vmem>>, vector<1x1x4x384xbf16>
    %48 = vector.shape_cast %47 : vector<1x1x4x384xbf16> to vector<4x384xbf16>
    %c8 = arith.constant 8 : index
    %c0_53 = arith.constant 0 : index
    %c0_54 = arith.constant 0 : index
    %49 = vector.load %arg2[%c8, %c0_53, %c0_54] : memref<9x8x4xbf16, #tpu.memory_space<vmem>>, vector<1x8x4xbf16>
    %50 = vector.shape_cast %49 : vector<1x8x4xbf16> to vector<8x4xbf16>
    %cst_55 = arith.constant dense<0.000000e+00> : vector<8x384xf32>
    %51 = tpu.matmul %50, %48, %cst_55 {dimension_numbers = #tpu.dot_dimension_numbers<[1], [0], [0], [1], [0, 0, 1, 1], [], []>} : vector<8x4xbf16>, vector<4x384xbf16>, vector<8x384xf32> -> vector<8x384xf32>
    %52 = arith.addf %46, %51 : vector<8x384xf32>
    %c0_56 = arith.constant 0 : index
    %c0_57 = arith.constant 0 : index
    %53 = vector.load %arg3[%c0_56, %c0_57] : memref<1x384xbf16, #tpu.memory_space<vmem>>, vector<1x384xbf16>
    %54 = arith.extf %53 : vector<1x384xbf16> to vector<1x384xf32>
    %55 = vector.broadcast %54 : vector<1x384xf32> to vector<8x384xf32>
    %56 = arith.mulf %52, %55 : vector<8x384xf32>
    %57 = arith.truncf %56 : vector<8x384xf32> to vector<8x384xbf16>
    %c0_58 = arith.constant 0 : index
    %c0_59 = arith.constant 0 : index
    %c0_60 = arith.constant 0 : index
    %58 = vector.load %arg5[%c0_58, %c0_59, %c0_60] : memref<1x8x384xbf16, #tpu.memory_space<vmem>>, vector<1x8x384xbf16>
    %59 = vector.shape_cast %58 : vector<1x8x384xbf16> to vector<8x384xbf16>
    %60 = vector.shape_cast %57 : vector<8x384xbf16> to vector<1x8x384xbf16>
    tpu.vector_store %arg5[%c0_58, %c0_59, %c0_60], %60 {strides = array<i32>} : memref<1x8x384xbf16, #tpu.memory_space<vmem>>, vector<1x8x384xbf16>,
    %cst_61 = arith.constant dense<0.000000e+00> : vector<8xf32>
    %61 = vector.multi_reduction <add>, %56, %cst_61 [1] : vector<8x384xf32> to vector<8xf32>
    %62 = vector.shape_cast %61 : vector<8xf32> to vector<8x1xf32>
    %c0_62 = arith.constant 0 : index
    %c0_63 = arith.constant 0 : index
    %c0_64 = arith.constant 0 : index
    %c0_65 = arith.constant 0 : index
    %63 = vector.load %arg6[%c0_62, %c0_63, %c0_64, %c0_65] : memref<1x1x8x2xf32, #tpu.memory_space<vmem>>, vector<1x1x8x1xf32>
    %64 = vector.shape_cast %63 : vector<1x1x8x1xf32> to vector<8x1xf32>
    %65 = vector.shape_cast %62 : vector<8x1xf32> to vector<1x1x8x1xf32>
    tpu.vector_store %arg6[%c0_62, %c0_63, %c0_64, %c0_65], %65 {strides = array<i32>} : memref<1x1x8x2xf32, #tpu.memory_space<vmem>>, vector<1x1x8x1xf32>,
    %66 = arith.mulf %56, %56 : vector<8x384xf32>
    %cst_66 = arith.constant dense<0.000000e+00> : vector<8xf32>
    %67 = vector.multi_reduction <add>, %66, %cst_66 [1] : vector<8x384xf32> to vector<8xf32>
    %68 = vector.shape_cast %67 : vector<8xf32> to vector<8x1xf32>
    %c0_67 = arith.constant 0 : index
    %c0_68 = arith.constant 0 : index
    %c0_69 = arith.constant 0 : index
    %c1_70 = arith.constant 1 : index
    %69 = vector.load %arg6[%c0_67, %c0_68, %c0_69, %c1_70] : memref<1x1x8x2xf32, #tpu.memory_space<vmem>>, vector<1x1x8x1xf32>
    %70 = vector.shape_cast %69 : vector<1x1x8x1xf32> to vector<8x1xf32>
    %71 = vector.shape_cast %68 : vector<8x1xf32> to vector<1x1x8x1xf32>
    tpu.vector_store %arg6[%c0_67, %c0_68, %c0_69, %c1_70], %71 {strides = array<i32>} : memref<1x1x8x2xf32, #tpu.memory_space<vmem>>, vector<1x1x8x1xf32>,
    return
  }
  func.func @transform_0(%arg0: i32, %arg1: i32) -> (i32, i32, i32) {
    %c0_i32 = arith.constant 0 : i32
    %c0_i32_0 = arith.constant 0 : i32
    %c0_i32_1 = arith.constant 0 : i32
    %c0_i32_2 = arith.constant 0 : i32
    return %c0_i32, %c0_i32_0, %c0_i32_1 : i32, i32, i32
  }
  func.func @transform_1(%arg0: i32, %arg1: i32) -> (i32, i32) {
    %c0_i32 = arith.constant 0 : i32
    %c0_i32_0 = arith.constant 0 : i32
    return %c0_i32, %arg1 : i32, i32
  }
  func.func @transform_2(%arg0: i32, %arg1: i32) -> (i32, i32, i32, i32) {
    %c0_i32 = arith.constant 0 : i32
    %c0_i32_0 = arith.constant 0 : i32
    %c0_i32_1 = arith.constant 0 : i32
    %c0_i32_2 = arith.constant 0 : i32
    return %arg0, %c0_i32, %c0_i32_0, %c0_i32_1 : i32, i32, i32, i32
  }
  func.func @transform_3(%arg0: i32, %arg1: i32) -> (i32, i32, i32) {
    %c0_i32 = arith.constant 0 : i32
    %c0_i32_0 = arith.constant 0 : i32
    return %arg0, %c0_i32, %arg1 : i32, i32, i32
  }
  func.func @transform_4(%arg0: i32, %arg1: i32) -> (i32, i32, i32, i32) {
    %c0_i32 = arith.constant 0 : i32
    %c0_i32_0 = arith.constant 0 : i32
    %c0_i32_1 = arith.constant 0 : i32
    return %arg0, %arg1, %c0_i32, %c0_i32_0 : i32, i32, i32, i32
  }
}

module attributes {stable_mosaic.version = 11 : i64} {
  func.func @_bn_relu6_kernel(%arg0: i32, %arg1: i32, %arg2: memref<8x1xf32, #tpu.memory_space<vmem>>, %arg3: memref<8x1xf32, #tpu.memory_space<vmem>>, %arg4: memref<1x8x384xbf16, #tpu.memory_space<vmem>>, %arg5: memref<1x8x384xf32, #tpu.memory_space<vmem>>) attributes {dimension_semantics = [#tpu.dimension_semantics<parallel>, #tpu.dimension_semantics<parallel>], iteration_bounds = array<i64: 2, 1>, scalar_prefetch = 0 : i64, scratch_operands = 0 : i64, tpu.core_type = #tpu.core_type<tc>, window_params = [{pipeline_mode = #tpu.pipeline_mode<synchronous>, transform_indices = @transform_0, window_bounds = array<i64: 8, 1>}, {pipeline_mode = #tpu.pipeline_mode<synchronous>, transform_indices = @transform_1, window_bounds = array<i64: 8, 1>}, {transform_indices = @transform_2, window_bounds = array<i64: 1, 8, 384>}, {transform_indices = @transform_3, window_bounds = array<i64: 1, 8, 384>}]} {
    %c0 = arith.constant 0 : index
    %c0_0 = arith.constant 0 : index
    %c0_1 = arith.constant 0 : index
    %0 = vector.load %arg4[%c0, %c0_0, %c0_1] : memref<1x8x384xbf16, #tpu.memory_space<vmem>>, vector<1x8x384xbf16>
    %1 = vector.shape_cast %0 : vector<1x8x384xbf16> to vector<8x384xbf16>
    %2 = arith.extf %1 : vector<8x384xbf16> to vector<8x384xf32>
    %c0_2 = arith.constant 0 : index
    %c0_3 = arith.constant 0 : index
    %3 = vector.load %arg2[%c0_2, %c0_3] : memref<8x1xf32, #tpu.memory_space<vmem>>, vector<8x1xf32>
    %4 = vector.broadcast %3 : vector<8x1xf32> to vector<8x384xf32>
    %5 = arith.mulf %2, %4 : vector<8x384xf32>
    %c0_4 = arith.constant 0 : index
    %c0_5 = arith.constant 0 : index
    %6 = vector.load %arg3[%c0_4, %c0_5] : memref<8x1xf32, #tpu.memory_space<vmem>>, vector<8x1xf32>
    %7 = vector.broadcast %6 : vector<8x1xf32> to vector<8x384xf32>
    %8 = arith.addf %5, %7 : vector<8x384xf32>
    %cst = arith.constant 0.000000e+00 : f32
    %cst_6 = arith.constant 6.000000e+00 : f32
    %9 = vector.broadcast %cst : f32 to vector<8x384xf32>
    %10 = arith.maximumf %9, %8 : vector<8x384xf32>
    %11 = vector.broadcast %cst_6 : f32 to vector<8x384xf32>
    %12 = arith.minimumf %11, %10 : vector<8x384xf32>
    %c0_7 = arith.constant 0 : index
    %c0_8 = arith.constant 0 : index
    %c0_9 = arith.constant 0 : index
    %13 = vector.load %arg5[%c0_7, %c0_8, %c0_9] : memref<1x8x384xf32, #tpu.memory_space<vmem>>, vector<1x8x384xf32>
    %14 = vector.shape_cast %13 : vector<1x8x384xf32> to vector<8x384xf32>
    %15 = vector.shape_cast %12 : vector<8x384xf32> to vector<1x8x384xf32>
    tpu.vector_store %arg5[%c0_7, %c0_8, %c0_9], %15 {strides = array<i32>} : memref<1x8x384xf32, #tpu.memory_space<vmem>>, vector<1x8x384xf32>,
    return
  }
  func.func @transform_0(%arg0: i32, %arg1: i32) -> (i32, i32) {
    %c0_i32 = arith.constant 0 : i32
    %c0_i32_0 = arith.constant 0 : i32
    %c0_i32_1 = arith.constant 0 : i32
    return %c0_i32, %c0_i32_0 : i32, i32
  }
  func.func @transform_1(%arg0: i32, %arg1: i32) -> (i32, i32) {
    %c0_i32 = arith.constant 0 : i32
    %c0_i32_0 = arith.constant 0 : i32
    %c0_i32_1 = arith.constant 0 : i32
    return %c0_i32, %c0_i32_0 : i32, i32
  }
  func.func @transform_2(%arg0: i32, %arg1: i32) -> (i32, i32, i32) {
    %c0_i32 = arith.constant 0 : i32
    %c0_i32_0 = arith.constant 0 : i32
    return %arg0, %c0_i32, %arg1 : i32, i32, i32
  }
  func.func @transform_3(%arg0: i32, %arg1: i32) -> (i32, i32, i32) {
    %c0_i32 = arith.constant 0 : i32
    %c0_i32_0 = arith.constant 0 : i32
    return %arg0, %c0_i32, %arg1 : i32, i32, i32
  }
}

</mosaic_0001>

<bundles_post_ra>
// kernel: conv_bn_forward.3
= control target key start
LH: loop header
LB: loop body
LE: loop exit
PB: predicated region body
PF: predicated region fallthrough
CT: control target
= control target key end

     0   :  { %s411_s12 = smov 0   ;;  %s413_s13 = smov 0   ;;  %s450_s0 = inlined_call_operand.vmem [shape: f32[8,1], index: 0, kind: input, shape index: {}]   ;;  %s451_s1 = inlined_call_operand.vmem [shape: f32[8,1], index: 1, kind: input, shape index: {}]   ;;  %s452_s2 = inlined_call_operand.vmem [shape: bf16[2,8,384], index: 2, kind: input, shape index: {}]   ;;  %s453_s3 = inlined_call_operand.vmem [shape: f32[2,8,384], index: 3, kind: output, shape index: {}]  }
   0x1   :  { %s415_s14 = smov 0  }
   0x2 LB: > { %s25_s15 = sadd.s32 1, %s384_s13  ;;  %p333_p0 = scmp.ge.s32.totalorder %s388_s14, 1  ;;  %s388_s14 = sphi %s415_s14, %s13_s14   ;;  %s384_s13 = sphi %s413_s13, %s455_s13   ;;  %s380_s12 = sphi %s411_s12, %s454_s12  }
   0x3   : > { %p27_p1 = scmp.ge.s32.totalorder %s25_s15, 2  ;;  %p158_p2 = scmp.lt.s32.totalorder %s388_s14, 3 }
   0x5   : > { %s457_s15 = smov (%p27_p1, %s25_s15), 0  ;;  %p159_p3 = pnand %p333_p0, %p158_p2 }
   0x6   : > { %p191_p4 = scmp.lt.s32.totalorder (!%p159_p3), %s380_s12, 1 }
   0x7   : > { %162 = sbr.rel (%p159_p3) target bundleno = 146 (0x92), region = 32 }
   0xc   : > { %v215_v0 = vld [vmem:[%s450_s0] sm:$0xff]  ;;  %v390_v1 = vmov 0   ;;  %s459_s12 = smov (!%p191_p4, %s380_s12), 1 }
   0xd   : > { %365 = vset.pattern.permute.xlu0 %v390_v1  ;;  %v224_v2 = vld [vmem:[%s451_s1] sm:$0xff]  ;;  %s338_s20 = smul.u32 12, %s459_s12 }
   0xe   : > { %218 = vperm.xlu0 %365, %v215_v0   ;;  %s339_s24 = smul.u32 24, %s459_s12 }
   0xf   : > { %s198_s23 = scalar_lea.vmem %s452_s2, %s338_s20 }
  0x10   : > { %v210_v4 = vld [vmem:[%s198_s23] sm:$0xff]  ;;  %v211_v5 = vld [vmem:[%s198_s23 + $0x8] sm:$0xf]  ;;  %s208_s27 = scalar_lea.vmem %s453_s3, %s339_s24 }
  0x11   : > { %v212_v6 = vunpack.c.l.bf16 %v210_v4  ;;  %v213_v7 = vunpack.c.h.bf16 %v210_v4  ;;  %v214_v8 = vunpack.c.l.bf16 %v211_v5 }
  0x16   : > { %227 = vperm.xlu0 %365, %v224_v2  }
  0x80   : > { %v219_v3 = vpop.permute.xlu0 %218 }
  0x81   : > { %v221_v9 = vmul.f32 %v219_v3, %v212_v6  ;;  %v222_v10 = vmul.f32 %v219_v3, %v213_v7  ;;  %v223_v11 = vmul.f32 %v219_v3, %v214_v8 }
  0x88   : > { %v228_v12 = vpop.permute.xlu0 %227 }
  0x89   : > { %v230_v13 = vadd.f32 %v228_v12, %v221_v9  ;;  %v231_v14 = vadd.f32 %v228_v12, %v222_v10  ;;  %v232_v15 = vadd.f32 %v228_v12, %v223_v11 }
  0x8b   : > { %v233_v16 = vmax.f32 %v230_v13, 0.0  ;;  %v234_v17 = vmax.f32 %v231_v14, 0.0  ;;  %v235_v18 = vmax.f32 %v232_v15, 0.0 }
  0x8d   : > { %v236_v19 = vmin.f32 %v233_v16, 6.0  ;;  %v237_v20 = vmin.f32 %v234_v17, 6.0  ;;  %v238_v21 = vmin.f32 %v235_v18, 6.0 }
  0x8f   : > { %239 = vst [vmem:[%s208_s27] sm:$0xff] %v236_v19 }
  0x90   : > { %240 = vst [vmem:[%s208_s27 + $0x8] sm:$0xff] %v237_v20 }
  0x91   : > { %241 = vst [vmem:[%s208_s27 + $0x10] sm:$0xff] %v238_v21 }
  0x92 PF: > { %s13_s14 = sadd.s32 1, %s388_s14   ;;  %s454_s12 = smov %s384_s13 }
  0x93   : > { %p10_p5 = scmp.ge.s32.totalorder %s13_s14, 4   ;;  %s455_s13 = smov %s457_s15 }
  0x95   :  { %12 = sbr.rel (!%p10_p5) target bundleno = 2 (0x2), region = 62 }

// kernel: conv_bn_forward.2
= control target key start
LH: loop header
LB: loop body
LE: loop exit
PB: predicated region body
PF: predicated region fallthrough
CT: control target
= control target key end

     0   :  { %s1252_s15 = smov 0   ;;  %s1254_s16 = smov 0   ;;  %s1414_s0 = inlined_call_operand.vmem [shape: bf16[9,8,4], index: 0, kind: input, shape index: {}]   ;;  %s1415_s1 = inlined_call_operand.vmem [shape: bf16[1,384], index: 1, kind: input, shape index: {}]   ;;  %s1416_s2 = inlined_call_operand.vmem [shape: bf16[2,1,4,512], index: 2, kind: input, shape index: {}]   ;;  %s1417_s3 = inlined_call_operand.vmem [shape: bf16[2,8,384], index: 3, kind: output, shape index: {0}]   ;;  %s1418_s4 = inlined_call_operand.vmem [shape: f32[2,1,8,2], index: 4, kind: output, shape index: {1}]  }
   0x1   :  { %s1256_s17 = smov 0  }
   0x2 LB: > { %s27_s18 = sadd.s32 1, %s1213_s16  ;;  %p1119_p0 = scmp.ge.s32.totalorder %s1217_s17, 1  ;;  %s1217_s17 = sphi %s1256_s17, %s15_s17   ;;  %s1213_s16 = sphi %s1254_s16, %s1420_s16   ;;  %s1209_s15 = sphi %s1252_s15, %s1419_s15  }
   0x3   : > { %p29_p1 = scmp.ge.s32.totalorder %s27_s18, 2  ;;  %p191_p2 = scmp.lt.s32.totalorder %s1217_s17, 3 }
   0x5   : > { %s1422_s18 = smov (%p29_p1, %s27_s18), 0  ;;  %p192_p3 = pnand %p1119_p0, %p191_p2 }
   0x6   : > { %p237_p4 = scmp.lt.s32.totalorder (!%p192_p3), %s1209_s15, 1  ;;  %s1219_s23 = smov (!%p192_p3), 127  }
   0x7   : > { %195 = sbr.rel (%p192_p3) target bundleno = 508 (0x1fc), region = 32  ;;  %s1220_s24 = smov (!%p192_p3), 126  }
   0x8   : > { %s1221_s25 = smov (!%p192_p3), 110   ;;  %s1222_s26 = smov (!%p192_p3), 109  }
   0x9   : > { %s1223_s27 = smov (!%p192_p3), 108   ;;  %s1224_s28 = smov (!%p192_p3), 92  }
   0xa   : > { %s1225_s29 = smov (!%p192_p3), 91   ;;  %s1226_s30 = smov (!%p192_p3), 90  }
   0xc   : > { %s1424_s15 = smov (!%p237_p4, %s1209_s15), 1  ;;  %vm291_vm0 = vcmask 1041408   ;;  %v261_v38 = vld [vmem:[%s1414_s0] sm:$0xf]  ;;  %vm287_vm1 = vcmask 31744   ;;  %vm414_vm2 = vcmask 1031168  }
   0xd   : > { %s1161_s19 = sshll.u32 %s1424_s15, 3  ;;  %vm283_vm3 = vcmask 1039360   ;;  %v1124_v55 = vld [vmem:[%s1414_s0 + $0x4] sm:$0xf]  ;;  %vm493_vm4 = vcmask 900096   ;;  %vm572_vm5 = vcmask 891904  }
   0xe   : > { %s241_s22 = scalar_lea.vmem %s1416_s2, %s1161_s19  ;;  %v1131_v62 = vld [vmem:[%s1414_s0 + $0x8] sm:$0xf]  ;;  %vm651_vm6 = vcmask 883712   ;;  %vm730_vm7 = vcmask 752640   ;;  %vm809_vm8 = vcmask 744448   ;;  %vm888_vm9 = vcmask 736256   ;;  %s258_s10 = scalar_lea.vmem %s1418_s4, %s1161_s19 }
   0xf   : > { %v1278_v0 = vld [vmem:[%s241_s22] sm:$0xff]  ;;  %vm969_vm10 = vcmask 7168   ;;  %vm978_vm11 = vcmask 15368  }
  0x10   : > { %266 = vst [vmem:[#allocation1] ss:$4 sm:$0xff] %v1278_v0  ;;  %v260_v1 = vld [vmem:[%s241_s22] sm:$0x3f] }
  0x17   : > { %v271_v2 = vld.sshfl [vmem:[#allocation1 + $0x10] sm:$0xff pattern:$0x73625140]  ;;  %v267_v3 = vld.sshfl [vmem:[#allocation1] sm:$0xff pattern:$0x73625140] }
  0x18   : > { %279 = vrot.lane.b32.xlu0 %v271_v2, %s1219_s23  ;;  %275 = vrot.lane.b32.xlu1 %v267_v3, %s1219_s23  ;;  %v273_v4 = vld.sshfl [vmem:[#allocation1 + $0x18] sm:$0xff pattern:$0x73625140]  ;;  %v269_v5 = vld.sshfl [vmem:[#allocation1 + $0x8] sm:$0xff pattern:$0x73625140] }
  0x19   : > { %341 = vst [vmem:[#allocation1] ss:$4 sm:$0xff] %v260_v1 }
  0x20   : > { %281 = vrot.lane.b32.xlu0 %v273_v4, %s1219_s23  ;;  %277 = vrot.lane.b32.xlu1 %v269_v5, %s1219_s23  ;;  %v1281_v6 = vld.sshfl [vmem:[#allocation1] sm:$0xff pattern:$0x73625140]  ;;  %v1283_v7 = vld.sshfl [vmem:[#allocation1 + $0x8] sm:$0xff pattern:$0x73625140] }
  0x21   : > { %v1285_v8 = vld.sshfl [vmem:[#allocation1 + $0x10] sm:$0xff pattern:$0x73625140]  ;;  %v348_v35 = vsel %vm291_vm0, %v1281_v6, 0  ;;  %v350_v46 = vsel %vm291_vm0, %v1283_v7, 0 }
  0x22   : > { %397 = vst [vmem:[#allocation1] ss:$4 sm:$0xff] %v1278_v0  ;;  %361 = vmatpush.bf16.msra.mxu3 %v348_v35  ;;  %v352_v50 = vsel %vm291_vm0, %v1285_v8, 0 }
  0x25   : > { %1128 = vmatmul.msk.bf16.vlgmr.msra.gmra.mxu3 %vm287_vm1, %v261_v38 }
  0x29   : > { %v400_v9 = vld.sshfl [vmem:[#allocation1 + $0x8] sm:$0xff pattern:$0x73625140]  ;;  %v402_v10 = vld.sshfl [vmem:[#allocation1 + $0x10] sm:$0xff pattern:$0x73625140] }
  0x2a   : > { %410 = vrot.lane.b32.xlu0 %v402_v10, %s1220_s24  ;;  %v398_v11 = vld.sshfl [vmem:[#allocation1] sm:$0xff pattern:$0x73625140]  ;;  %v404_v12 = vld.sshfl [vmem:[#allocation1 + $0x18] sm:$0xff pattern:$0x73625140] }
  0x2b   : > { %406 = vrot.lane.b32.xlu2 %v398_v11, %s1220_s24  ;;  %476 = vst [vmem:[#allocation1] ss:$4 sm:$0xff] %v1278_v0 }
  0x32   : > { %412 = vrot.lane.b32.xlu0 %v404_v12, %s1220_s24  ;;  %v479_v13 = vld.sshfl [vmem:[#allocation1 + $0x8] sm:$0xff pattern:$0x73625140]  ;;  %v481_v14 = vld.sshfl [vmem:[#allocation1 + $0x10] sm:$0xff pattern:$0x73625140] }
  0x33   : > { %v483_v15 = vld.sshfl [vmem:[#allocation1 + $0x18] sm:$0xff pattern:$0x73625140]  ;;  %487 = vrot.lane.b32.xlu1 %v479_v13, %s1221_s25  ;;  %408 = vrot.lane.b32.xlu2 %v400_v9, %s1220_s24  ;;  %v477_v16 = vld.sshfl [vmem:[#allocation1] sm:$0xff pattern:$0x73625140] }
  0x34   : > { %555 = vst [vmem:[#allocation1] ss:$4 sm:$0xff] %v1278_v0  ;;  %v1135_v12 = vld [vmem:[%s1414_s0 + $0xc] sm:$0xf] }
  0x3b   : > { %485 = vrot.lane.b32.xlu1 %v477_v16, %s1221_s25  ;;  %v560_v17 = vld.sshfl [vmem:[#allocation1 + $0x10] sm:$0xff pattern:$0x73625140]  ;;  %v556_v18 = vld.sshfl [vmem:[#allocation1] sm:$0xff pattern:$0x73625140]  ;;  %489 = vrot.lane.b32.xlu2 %v481_v14, %s1221_s25 }
  0x3c   : > { %568 = vrot.lane.b32.xlu0 %v560_v17, %s1222_s26  ;;  %v562_v19 = vld.sshfl [vmem:[#allocation1 + $0x18] sm:$0xff pattern:$0x73625140]  ;;  %v558_v20 = vld.sshfl [vmem:[#allocation1 + $0x8] sm:$0xff pattern:$0x73625140] }
  0x3d   : > { %634 = vst [vmem:[#allocation1] ss:$4 sm:$0xff] %v1278_v0 }
  0x43   : > { %570 = vrot.lane.b32.xlu1 %v562_v19, %s1222_s26  ;;  %491 = vrot.lane.b32.xlu2 %v483_v15, %s1221_s25 }
  0x44   : > { %566 = vrot.lane.b32.xlu0 %v558_v20, %s1222_s26  ;;  %v637_v21 = vld.sshfl [vmem:[#allocation1 + $0x8] sm:$0xff pattern:$0x73625140]  ;;  %v639_v22 = vld.sshfl [vmem:[#allocation1 + $0x10] sm:$0xff pattern:$0x73625140] }
  0x45   : > { %v641_v23 = vld.sshfl [vmem:[#allocation1 + $0x18] sm:$0xff pattern:$0x73625140]  ;;  %v635_v24 = vld.sshfl [vmem:[#allocation1] sm:$0xff pattern:$0x73625140] }
  0x46   : > { %713 = vst [vmem:[#allocation1] ss:$4 sm:$0xff] %v1278_v0 }
  0x4b   : > { %643 = vrot.lane.b32.xlu1 %v635_v24, %s1223_s27  ;;  %564 = vrot.lane.b32.xlu2 %v556_v18, %s1222_s26 }
  0x4d   : > { %v720_v25 = vld.sshfl [vmem:[#allocation1 + $0x18] sm:$0xff pattern:$0x73625140]  ;;  %v714_v26 = vld.sshfl [vmem:[#allocation1] sm:$0xff pattern:$0x73625140] }
  0x4e   : > { %722 = vrot.lane.b32.xlu0 %v714_v26, %s1224_s28  ;;  %v716_v27 = vld.sshfl [vmem:[#allocation1 + $0x8] sm:$0xff pattern:$0x73625140]  ;;  %v718_v28 = vld.sshfl [vmem:[#allocation1 + $0x10] sm:$0xff pattern:$0x73625140] }
  0x4f   : > { %792 = vst [vmem:[#allocation1] ss:$4 sm:$0xff] %v1278_v0 }
  0x53   : > { %724 = vrot.lane.b32.xlu1 %v716_v27, %s1224_s28  ;;  %645 = vrot.lane.b32.xlu2 %v637_v21, %s1223_s27 }
  0x56   : > { %649 = vrot.lane.b32.xlu0 %v641_v23, %s1223_s27  ;;  %v793_v29 = vld.sshfl [vmem:[#allocation1] sm:$0xff pattern:$0x73625140]  ;;  %v795_v30 = vld.sshfl [vmem:[#allocation1 + $0x8] sm:$0xff pattern:$0x73625140] }
  0x57   : > { %v797_v31 = vld.sshfl [vmem:[#allocation1 + $0x10] sm:$0xff pattern:$0x73625140]  ;;  %v799_v32 = vld.sshfl [vmem:[#allocation1 + $0x18] sm:$0xff pattern:$0x73625140] }
  0x58   : > { %871 = vst [vmem:[#allocation1] ss:$4 sm:$0xff] %v1278_v0 }
  0x5b   : > { %726 = vrot.lane.b32.xlu1 %v718_v28, %s1224_s28  ;;  %647 = vrot.lane.b32.xlu2 %v639_v22, %s1223_s27 }
  0x5e   : > { %805 = vrot.lane.b32.xlu0 %v797_v31, %s1225_s29  ;;  %v1139_v31 = vld [vmem:[%s1414_s0 + $0x10] sm:$0xf] }
  0x5f   : > { %v876_v33 = vld.sshfl [vmem:[#allocation1 + $0x10] sm:$0xff pattern:$0x73625140]  ;;  %v872_v34 = vld.sshfl [vmem:[#allocation1] sm:$0xff pattern:$0x73625140] }
  0x60   : > { %v874_v36 = vld.sshfl [vmem:[#allocation1 + $0x8] sm:$0xff pattern:$0x73625140]  ;;  %v878_v37 = vld.sshfl [vmem:[#allocation1 + $0x18] sm:$0xff pattern:$0x73625140] }
  0x63   : > { %728 = vrot.lane.b32.xlu1 %v720_v25, %s1224_s28  ;;  %803 = vrot.lane.b32.xlu2 %v795_v30, %s1225_s29 }
  0x66   : > { %807 = vrot.lane.b32.xlu0 %v799_v32, %s1225_s29 }
  0x6b   : > { %884 = vrot.lane.b32.xlu1 %v876_v33, %s1226_s30  ;;  %801 = vrot.lane.b32.xlu2 %v793_v29, %s1225_s29  ;;  %v1143_v29 = vld [vmem:[%s1414_s0 + $0x14] sm:$0xf] }
  0x6e   : > { %880 = vrot.lane.b32.xlu0 %v872_v34, %s1226_s30 }
  0x73   : > { %882 = vrot.lane.b32.xlu1 %v874_v36, %s1226_s30  ;;  %886 = vrot.lane.b32.xlu2 %v878_v37, %s1226_s30  ;;  %s1162_s30 = smul.u32 12, %s1424_s15 }
  0x75   : > { %s250_s7 = scalar_lea.vmem %s1417_s3, %s1162_s30 }
  0x85   : > { %v407_v39 = vpop.permute.xlu2 %406 }
  0x8a   : > { %v280_v40 = vpop.permute.xlu0 %279  ;;  %v276_v41 = vpop.permute.xlu1 %275 }
  0x8d   : > { %v409_v42 = vpop.permute.xlu2 %408 }
  0x8e   : > { %v415_v43 = vsel %vm414_vm2, %v407_v39, %v409_v42 }
  0x8f   : > { %v422_v54 = vsel %vm291_vm0, %v415_v43, 0 }
  0x92   : > { %v282_v44 = vpop.permute.xlu0 %281  ;;  %v278_v45 = vpop.permute.xlu1 %277 }
  0x93   : > { %v284_v47 = vsel %vm283_vm3, %v276_v41, %v278_v45  ;;  %v285_v48 = vsel %vm283_vm3, %v278_v45, %v280_v40  ;;  %v286_v49 = vsel %vm283_vm3, %v280_v40, %v282_v44  ;;  %v1147_v44 = vld [vmem:[%s1414_s0 + $0x18] sm:$0xf] }
  0x94   : > { %v293_v51 = vsel %vm291_vm0, %v284_v47, 0  ;;  %v296_v52 = vsel %vm291_vm0, %v285_v48, 0  ;;  %v299_v53 = vsel %vm291_vm0, %v286_v49, 0 }
  0x95   : > { %308 = vmatpush.bf16.msra.mxu0 %v293_v51  ;;  %321 = vmatpush.bf16.msra.mxu1 %v296_v52  ;;  %v490_v56 = vpop.permute.xlu2 %489 }
  0x96   : > { %334 = vmatpush.bf16.msra.mxu2 %v299_v53 }
  0x98   : > { %1125 = vmatmul.msk.bf16.vlgmr.msra.gmra.mxu0 %vm287_vm1, %v1124_v55  ;;  %1126 = vmatmul.msk.bf16.vlgmr.msra.gmra.mxu1 %vm287_vm1, %v1124_v55 }
  0x99   : > { %374 = vmatpush.bf16.msrb.mxu0 %v350_v46  ;;  %387 = vmatpush.bf16.msrb.mxu1 %v352_v50 }
  0x9a   : > { %437 = vmatpush.bf16.msrb.mxu2 %v422_v54 }
  0x9b   : > { %1127 = vmatmul.msk.bf16.vlgmr.msra.gmra.mxu2 %vm287_vm1, %v1124_v55 }
  0x9c   : > { %v411_v57 = vpop.permute.xlu0 %410 }
  0x9d   : > { %v416_v58 = vsel %vm414_vm2, %v409_v42, %v411_v57  ;;  %v492_v59 = vpop.permute.xlu2 %491 }
  0x9e   : > { %v425_v60 = vsel %vm291_vm0, %v416_v58, 0  ;;  %v496_v61 = vsel %vm493_vm4, %v490_v56, %v492_v59 }
  0x9f   : > { %450 = vmatpush.bf16.msrb.mxu3 %v425_v60  ;;  %v507_v63 = vsel %vm291_vm0, %v496_v61, 0 }
  0xa2   : > { %1133 = vmatmul.msk.bf16.vlgmr.msrb.gmra.mxu3 %vm287_vm1, %v1131_v62 }
  0xa3   : > { %542 = vmatpush.bf16.msra.mxu3 %v507_v63 }
  0xa4   : > { %v413_v0 = vpop.permute.xlu0 %412 }
  0xa5   : > { %v417_v1 = vsel %vm414_vm2, %v411_v57, %v413_v0  ;;  %v488_v2 = vpop.permute.xlu1 %487  ;;  %v565_v3 = vpop.permute.xlu2 %564  ;;  %v1151_v57 = vld [vmem:[%s1414_s0 + $0x1c] sm:$0xf]  ;;  %v1155_v0 = vld [vmem:[%s1414_s0 + $0x20] sm:$0xf] }
  0xa6   : > { %v428_v4 = vsel %vm291_vm0, %v417_v1, 0  ;;  %v495_v5 = vsel %vm493_vm4, %v488_v2, %v490_v56 }
  0xa7   : > { %v504_v6 = vsel %vm291_vm0, %v495_v5, 0  ;;  %463 = vmatpush.bf16.msra.mxu0 %v428_v4 }
  0xa8   : > { %529 = vmatpush.bf16.msra.mxu2 %v504_v6  ;;  %1129 = vmatmul.msk.bf16.vlgmr.msrb.gmra.mxu0 %vm287_vm1, %v261_v38  ;;  %v363_v1 = vpop.f32.mrf.mxu3 }
  0xa9   : > { %1130 = vmatmul.msk.bf16.vlgmr.msrb.gmra.mxu1 %vm287_vm1, %v261_v38 }
  0xab   : > { %1132 = vmatmul.msk.bf16.vlgmr.msrb.gmra.mxu2 %vm287_vm1, %v1131_v62 }
  0xad   : > { %v486_v7 = vpop.permute.xlu1 %485  ;;  %v646_v8 = vpop.permute.xlu2 %645 }
  0xae   : > { %v494_v9 = vsel %vm493_vm4, %v486_v7, %v488_v2  ;;  %v569_v10 = vpop.permute.xlu0 %568 }
  0xaf   : > { %v501_v11 = vsel %vm291_vm0, %v494_v9, 0 }
  0xb0   : > { %516 = vmatpush.bf16.msra.mxu1 %v501_v11  ;;  %v365_v2 = vpop.f32.mrf.mxu3 }
  0xb2   : > { %1138 = vmatmul.msk.bf16.vlgmr.msra.gmra.mxu3 %vm287_vm1, %v1135_v12 }
  0xb5   : > { %v571_v13 = vpop.permute.xlu1 %570  ;;  %v648_v14 = vpop.permute.xlu2 %647 }
  0xb6   : > { %v575_v15 = vsel %vm572_vm5, %v569_v10, %v571_v13  ;;  %v567_v16 = vpop.permute.xlu0 %566  ;;  %v653_v17 = vsel %vm651_vm6, %v646_v8, %v648_v14 }
  0xb7   : > { %v586_v18 = vsel %vm291_vm0, %v575_v15, 0  ;;  %v574_v19 = vsel %vm572_vm5, %v567_v16, %v569_v10  ;;  %v573_v20 = vsel %vm572_vm5, %v565_v3, %v567_v16  ;;  %v662_v23 = vsel %vm291_vm0, %v653_v17, 0 }
  0xb8   : > { %v583_v21 = vsel %vm291_vm0, %v574_v19, 0  ;;  %v580_v22 = vsel %vm291_vm0, %v573_v20, 0  ;;  %621 = vmatpush.bf16.msrb.mxu2 %v586_v18  ;;  %1134 = vmatmul.msk.bf16.vlgmr.msra.gmra.mxu0 %vm287_vm1, %v1131_v62 }
  0xb9   : > { %608 = vmatpush.bf16.msrb.mxu1 %v583_v21  ;;  %595 = vmatpush.bf16.msrb.mxu0 %v580_v22 }
  0xba   : > { %1136 = vmatmul.msk.bf16.vlgmr.msra.gmra.mxu1 %vm287_vm1, %v1135_v12 }
  0xbb   : > { %1137 = vmatmul.msk.bf16.vlgmr.msra.gmra.mxu2 %vm287_vm1, %v1135_v12 }
  0xbd   : > { %687 = vmatpush.bf16.msra.mxu0 %v662_v23  ;;  %v644_v24 = vpop.permute.xlu1 %643  ;;  %v804_v25 = vpop.permute.xlu2 %803 }
  0xbe   : > { %v652_v26 = vsel %vm651_vm6, %v644_v24, %v646_v8 }
  0xbf   : > { %v659_v27 = vsel %vm291_vm0, %v652_v26, 0 }
  0xc0   : > { %v723_v28 = vpop.permute.xlu0 %722  ;;  %674 = vmatpush.bf16.msrb.mxu3 %v659_v27 }
  0xc3   : > { %1144 = vmatmul.msk.bf16.vlgmr.msrb.gmra.mxu3 %vm287_vm1, %v1143_v29 }
  0xc5   : > { %v725_v30 = vpop.permute.xlu1 %724  ;;  %v802_v32 = vpop.permute.xlu2 %801 }
  0xc6   : > { %v731_v33 = vsel %vm730_vm7, %v723_v28, %v725_v30  ;;  %v810_v34 = vsel %vm809_vm8, %v802_v32, %v804_v25 }
  0xc7   : > { %v738_v35 = vsel %vm291_vm0, %v731_v33, 0  ;;  %v817_v38 = vsel %vm291_vm0, %v810_v34, 0 }
  0xc8   : > { %753 = vmatpush.bf16.msra.mxu2 %v738_v35  ;;  %v650_v36 = vpop.permute.xlu0 %649  ;;  %1140 = vmatmul.msk.bf16.vlgmr.msrb.gmra.mxu0 %vm287_vm1, %v1139_v31 }
  0xc9   : > { %v654_v37 = vsel %vm651_vm6, %v648_v14, %v650_v36 }
  0xca   : > { %v665_v39 = vsel %vm291_vm0, %v654_v37, 0  ;;  %1141 = vmatmul.msk.bf16.vlgmr.msrb.gmra.mxu1 %vm287_vm1, %v1139_v31 }
  0xcb   : > { %1142 = vmatmul.msk.bf16.vlgmr.msrb.gmra.mxu2 %vm287_vm1, %v1139_v31  ;;  %700 = vmatpush.bf16.msra.mxu1 %v665_v39 }
  0xcd   : > { %v727_v40 = vpop.permute.xlu1 %726  ;;  %v887_v53 = vpop.permute.xlu2 %886 }
  0xce   : > { %v732_v41 = vsel %vm730_vm7, %v725_v30, %v727_v40 }
  0xcf   : > { %832 = vmatpush.bf16.msrb.mxu1 %v817_v38  ;;  %v741_v42 = vsel %vm291_vm0, %v732_v41, 0 }
  0xd0   : > { %766 = vmatpush.bf16.msra.mxu3 %v741_v42  ;;  %v806_v43 = vpop.permute.xlu0 %805 }
  0xd1   : > { %v811_v45 = vsel %vm809_vm8, %v804_v25, %v806_v43 }
  0xd2   : > { %v820_v46 = vsel %vm291_vm0, %v811_v45, 0 }
  0xd3   : > { %1149 = vmatmul.msk.bf16.vlgmr.msra.gmra.mxu3 %vm287_vm1, %v1147_v44  ;;  %845 = vmatpush.bf16.msrb.mxu2 %v820_v46 }
  0xd5   : > { %v729_v47 = vpop.permute.xlu1 %728 }
  0xd6   : > { %v733_v48 = vsel %vm730_vm7, %v727_v40, %v729_v47 }
  0xd7   : > { %v744_v49 = vsel %vm291_vm0, %v733_v48, 0 }
  0xd8   : > { %779 = vmatpush.bf16.msrb.mxu0 %v744_v49  ;;  %v808_v50 = vpop.permute.xlu0 %807  ;;  %v946_v49 = vld [vmem:[%s1415_s1] sm:$0x7] }
  0xd9   : > { %v812_v51 = vsel %vm809_vm8, %v806_v43, %v808_v50  ;;  %1145 = vmatmul.msk.bf16.vlgmr.msra.gmra.mxu0 %vm287_vm1, %v1143_v29 }
  0xda   : > { %v823_v52 = vsel %vm291_vm0, %v812_v51, 0  ;;  %1146 = vmatmul.msk.bf16.vlgmr.msra.gmra.mxu1 %vm287_vm1, %v1143_v29 }
  0xdb   : > { %1148 = vmatmul.msk.bf16.vlgmr.msra.gmra.mxu2 %vm287_vm1, %v1147_v44  ;;  %858 = vmatpush.bf16.msrb.mxu3 %v823_v52 }
  0xdd   : > { %v885_v54 = vpop.permute.xlu1 %884 }
  0xde   : > { %v891_v55 = vsel %vm888_vm9, %v885_v54, %v887_v53 }
  0xdf   : > { %v902_v56 = vsel %vm291_vm0, %v891_v55, 0  ;;  %v947_v55 = vunpack.c.l.bf16 %v946_v49 }
  0xe0   : > { %937 = vmatpush.bf16.msra.mxu2 %v902_v56  ;;  %v881_v58 = vpop.permute.xlu0 %880 }
  0xe3   : > { %1154 = vmatmul.msk.bf16.vlgmr.msrb.gmra.mxu3 %vm287_vm1, %v1151_v57 }
  0xe5   : > { %v883_v59 = vpop.permute.xlu1 %882 }
  0xe6   : > { %v890_v60 = vsel %vm888_vm9, %v883_v59, %v885_v54  ;;  %v889_v61 = vsel %vm888_vm9, %v881_v58, %v883_v59 }
  0xe7   : > { %v899_v62 = vsel %vm291_vm0, %v890_v60, 0  ;;  %v896_v63 = vsel %vm291_vm0, %v889_v61, 0 }
  0xe8   : > { %924 = vmatpush.bf16.msra.mxu1 %v899_v62  ;;  %911 = vmatpush.bf16.msra.mxu0 %v896_v63  ;;  %v949_v63 = vperm.slane %v947_v55, 0 }
  0xe9   : > { %1150 = vmatmul.msk.bf16.vlgmr.msrb.gmra.mxu0 %vm287_vm1, %v1147_v44 }
  0xea   : > { %1152 = vmatmul.msk.bf16.vlgmr.msrb.gmra.mxu1 %vm287_vm1, %v1151_v57 }
  0xeb   : > { %1153 = vmatmul.msk.bf16.vlgmr.msrb.gmra.mxu2 %vm287_vm1, %v1151_v57 }
  0xf9   : > { %1156 = vmatmul.msk.bf16.vlgmr.msra.gmra.mxu0 %vm287_vm1, %v1155_v0 }
  0xfa   : > { %1157 = vmatmul.msk.bf16.vlgmr.msra.gmra.mxu1 %vm287_vm1, %v1155_v0 }
  0xfb   : > { %1158 = vmatmul.msk.bf16.vlgmr.msra.gmra.mxu2 %vm287_vm1, %v1155_v0  ;;  %v950_v0 = vperm.slane %v947_v55, 2 }
 0x115   : > { %v310_v3 = vpop.f32.mrf.mxu0  ;;  %v323_v4 = vpop.f32.mrf.mxu1 }
 0x116   : > { %v364_v5 = vadd.f32 %v363_v1, %v310_v3 }
 0x11d   : > { %v312_v7 = vpop.f32.mrf.mxu0  ;;  %v325_v8 = vpop.f32.mrf.mxu1 }
 0x11e   : > { %v336_v6 = vpop.f32.mrf.mxu2  ;;  %v955_v7 = vperm.slane %v949_v63, 0 }
 0x125   : > { %v376_v10 = vpop.f32.mrf.mxu0  ;;  %v452_v11 = vpop.f32.mrf.mxu3 }
 0x126   : > { %v338_v9 = vpop.f32.mrf.mxu2  ;;  %v377_v12 = vadd.f32 %v376_v10, %v323_v4  ;;  %v389_v13 = vpop.f32.mrf.mxu1  ;;  %v956_v10 = vperm.slane %v950_v0, 0 }
 0x127   : > { %v390_v14 = vadd.f32 %v389_v13, %v336_v6 }
 0x128   : > { %v470_v15 = vadd.f32 %v452_v11, %v377_v12 }
 0x12d   : > { %v378_v17 = vpop.f32.mrf.mxu0  ;;  %v454_v18 = vpop.f32.mrf.mxu3 }
 0x12e   : > { %v439_v16 = vpop.f32.mrf.mxu2  ;;  %v391_v19 = vpop.f32.mrf.mxu1 }
 0x12f   : > { %v469_v48 = vadd.f32 %v439_v16, %v364_v5 }
 0x135   : > { %v465_v21 = vpop.f32.mrf.mxu0  ;;  %v544_v22 = vpop.f32.mrf.mxu3 }
 0x136   : > { %v441_v20 = vpop.f32.mrf.mxu2  ;;  %v471_v53 = vadd.f32 %v465_v21, %v390_v14  ;;  %v951_v14 = vperm.slane %v947_v55, 4 }
 0x137   : > { %v518_v23 = vpop.f32.mrf.mxu1 }
 0x138   : > { %v548_v50 = vadd.f32 %v518_v23, %v469_v48  ;;  %v550_v61 = vadd.f32 %v544_v22, %v471_v53  ;;  %v957_v19 = vperm.slane %v951_v14, 0 }
 0x13d   : > { %v467_v25 = vpop.f32.mrf.mxu0  ;;  %v546_v26 = vpop.f32.mrf.mxu3 }
 0x13e   : > { %v531_v24 = vpop.f32.mrf.mxu2 }
 0x13f   : > { %v520_v27 = vpop.f32.mrf.mxu1  ;;  %v549_v51 = vadd.f32 %v531_v24, %v470_v15 }
 0x145   : > { %v597_v29 = vpop.f32.mrf.mxu0 }
 0x146   : > { %v533_v28 = vpop.f32.mrf.mxu2  ;;  %v676_v30 = vpop.f32.mrf.mxu3  ;;  %v627_v54 = vadd.f32 %v597_v29, %v548_v50 }
 0x147   : > { %v610_v31 = vpop.f32.mrf.mxu1 }
 0x148   : > { %v628_v56 = vadd.f32 %v610_v31, %v549_v51  ;;  %v706_v62 = vadd.f32 %v676_v30, %v627_v54 }
 0x14d   : > { %v599_v33 = vpop.f32.mrf.mxu0 }
 0x14e   : > { %v623_v32 = vpop.f32.mrf.mxu2  ;;  %v678_v34 = vpop.f32.mrf.mxu3 }
 0x14f   : > { %v612_v35 = vpop.f32.mrf.mxu1  ;;  %v629_v1 = vadd.f32 %v623_v32, %v550_v61 }
 0x156   : > { %v625_v36 = vpop.f32.mrf.mxu2  ;;  %v689_v37 = vpop.f32.mrf.mxu0 }
 0x157   : > { %v768_v38 = vpop.f32.mrf.mxu3  ;;  %v702_v39 = vpop.f32.mrf.mxu1  ;;  %v707_v60 = vadd.f32 %v689_v37, %v628_v56 }
 0x158   : > { %v708_v5 = vadd.f32 %v702_v39, %v629_v1 }
 0x159   : > { %v786_v3 = vadd.f32 %v768_v38, %v707_v60 }
 0x15e   : > { %v755_v40 = vpop.f32.mrf.mxu2  ;;  %v691_v41 = vpop.f32.mrf.mxu0 }
 0x15f   : > { %v770_v42 = vpop.f32.mrf.mxu3  ;;  %v704_v43 = vpop.f32.mrf.mxu1  ;;  %v785_v2 = vadd.f32 %v755_v40, %v706_v62 }
 0x166   : > { %v757_v44 = vpop.f32.mrf.mxu2  ;;  %v781_v45 = vpop.f32.mrf.mxu0 }
 0x167   : > { %v860_v46 = vpop.f32.mrf.mxu3  ;;  %v834_v47 = vpop.f32.mrf.mxu1  ;;  %v787_v11 = vadd.f32 %v781_v45, %v708_v5 }
 0x168   : > { %v864_v6 = vadd.f32 %v834_v47, %v785_v2 }
 0x169   : > { %v866_v18 = vadd.f32 %v860_v46, %v787_v11 }
 0x16e   : > { %v847_v52 = vpop.f32.mrf.mxu2  ;;  %v783_v57 = vpop.f32.mrf.mxu0 }
 0x16f   : > { %v862_v58 = vpop.f32.mrf.mxu3  ;;  %v836_v59 = vpop.f32.mrf.mxu1  ;;  %v865_v8 = vadd.f32 %v847_v52, %v786_v3 }
 0x176   : > { %v849_v4 = vpop.f32.mrf.mxu2  ;;  %v913_v9 = vpop.f32.mrf.mxu0 }
 0x177   : > { %v943_v12 = vadd.f32 %v913_v9, %v864_v6  ;;  %v926_v13 = vpop.f32.mrf.mxu1 }
 0x178   : > { %v944_v15 = vadd.f32 %v926_v13, %v865_v8 }
 0x179   : > { %v958_v16 = vmul.f32 %v955_v7, %v943_v12 }
 0x17a   : > { %v959_v17 = vmul.f32 %v956_v10, %v944_v15 }
 0x17b   : > { %v971_v20 = vmul.f32 %v958_v16, %v958_v16 }
 0x17c   : > { %v961_v21 = vpack.c.bf16 %v959_v17, %v958_v16  ;;  %v965_v23 = vadd.f32 %v959_v17, %v958_v16  ;;  %v972_v24 = vmul.f32 %v959_v17, %v959_v17 }
 0x17e   : > { %v939_v22 = vpop.f32.mrf.mxu2  ;;  %963 = vst [vmem:[%s250_s7] sm:$0xff] %v961_v21  ;;  %v915_v26 = vpop.f32.mrf.mxu0  ;;  %v974_v27 = vadd.f32 %v972_v24, %v971_v20 }
 0x17f   : > { %v945_v25 = vadd.f32 %v939_v22, %v866_v18  ;;  %v928_v29 = vpop.f32.mrf.mxu1 }
 0x181   : > { %v960_v28 = vmul.f32 %v957_v19, %v945_v25 }
 0x183   : > { %v962_v30 = vpack.c.bf16 %v960_v28, %v960_v28  ;;  %v966_v31 = vadd.f32 %v965_v23, %v960_v28  ;;  %v973_v32 = vmul.f32 %v960_v28, %v960_v28 }
 0x185   : > { %964 = vst [vmem:[%s250_s7 + $0x8] sm:$0xf] %v962_v30  ;;  %967 = vadd.xlane.f32.xlu2 %v966_v31  ;;  %v975_v33 = vadd.f32 %v974_v27, %v973_v32 }
 0x186   : > { %v941_v34 = vpop.f32.mrf.mxu2 }
 0x187   : > { %976 = vadd.xlane.f32.xlu0 %v975_v33 }
 0x1f8   : > { %v968_v35 = vpop.xlane.xlu2 %967 }
 0x1f9   : > { %970 = vst.msk [vmem:[%s258_s10] sm:$0xff] %vm969_vm10, %v968_v35 }
 0x1fa   : > { %v977_v36 = vpop.xlane.xlu0 %976 }
 0x1fb   : > { %979 = vst.msk [vmem:[%s258_s10] sm:$0xff] %vm978_vm11, %v977_v36 }
 0x1fc PF: > { %s15_s17 = sadd.s32 1, %s1217_s17   ;;  %s1419_s15 = smov %s1213_s16 }
 0x1fd   : > { %p12_p5 = scmp.ge.s32.totalorder %s15_s17, 4   ;;  %s1420_s16 = smov %s1422_s18 }
 0x1ff   :  { %14 = sbr.rel (!%p12_p5) target bundleno = 2 (0x2), region = 85 }

</bundles_post_ra>
